<compile_context>
chip_gen: v7x
topology: tpu7x:2x2x1
jax: 0.10.0
libtpu: 0.0.40
codegen_flags: <defaults>
</compile_context>

<pallas_src>
import functools
import math

import jax
import jax.numpy as jnp
from jax.experimental import pallas as pl
from jax.experimental.pallas import tpu as pltpu


_ACTIVATIONS = {
    "relu": lambda v: jnp.maximum(v, 0.0),
    # PyTorch nn.GELU() default is the exact (erf-based) variant.
    "gelu": lambda v: jax.nn.gelu(v, approximate=False),
    # tanh-form GELU: prefer on v5e (EUP transcendental, frees VALU slots);
    # small numerics deviation from PyTorch nn.GELU() exact.
    "gelu_tanh": lambda v: jax.nn.gelu(v, approximate=True),
}


def _round_up(n, m):
    return ((n + m - 1) // m) * m


def _pad_to(a, shape):
    pads = [(0, t - s) for s, t in zip(a.shape, shape)]
    return jnp.pad(a, pads)


def _head_kernel(x_ref, w1_ref, b1_ref, gamma_ref, beta_ref,
                 w2_ref, b2_ref, w3_ref, b3_ref, o_ref,
                 *, ln_dim, activation):
    act = _ACTIVATIONS[activation]

    # ---- Linear 1: cast x to bf16 in VMEM (cheap pack), MXU with f32 acc ----
    x = x_ref[...].astype(jnp.bfloat16)
    h = jnp.dot(x, w1_ref[...], preferred_element_type=jnp.float32)
    h = act(h + b1_ref[...])

    # ---- LayerNorm over the *real* ln_dim features, single pass ----
    # Padded feature columns are exactly zero (zero weight columns + zero bias,
    # act(0) == 0), so summing over the full padded lane width and dividing by
    # ln_dim is exact.
    s1 = jnp.sum(h, axis=-1, keepdims=True)
    s2 = jnp.sum(h * h, axis=-1, keepdims=True)
    inv_n = 1.0 / ln_dim
    mean = s1 * inv_n
    var = jnp.maximum(s2 * inv_n - mean * mean, 0.0)
    h = (h - mean) * jax.lax.rsqrt(var + 1e-5)
    # gamma/beta are zero-padded, so padded columns return to exactly zero.
    h = h * gamma_ref[...] + beta_ref[...]

    # ---- Dropout: identity at inference ----
    # TODO(synk): training-mode dropout (p=0.2/0.25/0.15) would use
    # pltpu.prng_seed + pltpu.stateful_bernoulli here.

    # ---- Linear 2 + activation ----
    h2 = jnp.dot(h.astype(jnp.bfloat16), w2_ref[...],
                 preferred_element_type=jnp.float32)
    h2 = act(h2 + b2_ref[...])

    # ---- Linear 3: final projection to the real 2*num_horizons logits ----
    out = jnp.dot(h2.astype(jnp.bfloat16), w3_ref[...],
                  preferred_element_type=jnp.float32)
    o_ref[...] = (out + b3_ref[...]).astype(o_ref.dtype)


def _pick_batch_tile(batch, d, h1_pad, h2_pad, o, budget_bytes):
    """Largest sublane-aligned batch tile fitting a conservative VMEM budget."""
    # Grid-invariant operands are single-buffered (pl.Buffered(1)).
    fixed = 2 * (d * h1_pad + h1_pad * h2_pad + h2_pad * o)        # bf16 weights
    fixed += 4 * (3 * h1_pad + h2_pad + o)                         # f32 bias/ln rows
    # Per-batch-row bytes: double-buffered f32 x and out tiles plus the resident
    # f32 intermediates h / h2.
    per_row = 2 * 4 * (d + o) + 4 * (h1_pad + h2_pad)
    # Cap at 4096 rows (per-step overhead ~0.35us becomes negligible) and aim
    # for >= 4 grid steps when the batch allows it (2 per TensorCore on v7x so
    # both cores run and each still double-buffers its x/out tiles).
    tile = min(4096, _round_up(max(pl.cdiv(batch, 4), 8), 8))
    while tile > 8 and fixed + tile * per_row > budget_bytes:
        tile = _round_up(tile // 2, 8)
    return tile


def prepare_params(params):
    """Pad + cast weights ONCE (call outside the hot per-step forward path).

    Hidden dims are zero-padded to multiples of 128 (lane-dense matmuls); the
    input feature dim and the output logit dim are left at their real sizes.
    """
    D, H1 = params["w1"].shape
    H2 = params["w2"].shape[1]
    O = params["w3"].shape[1]
    h1_pad = _round_up(H1, 128)
    h2_pad = _round_up(H2, 128)
    return {
        "w1": _pad_to(params["w1"], (D, h1_pad)).astype(jnp.bfloat16),
        "b1": _pad_to(params["b1"], (1, h1_pad)).astype(jnp.float32),
        "gamma": _pad_to(params["gamma"], (1, h1_pad)).astype(jnp.float32),
        "beta": _pad_to(params["beta"], (1, h1_pad)).astype(jnp.float32),
        "w2": _pad_to(params["w2"], (h1_pad, h2_pad)).astype(jnp.bfloat16),
        "b2": _pad_to(params["b2"], (1, h2_pad)).astype(jnp.float32),
        "w3": _pad_to(params["w3"], (h2_pad, O)).astype(jnp.bfloat16),
        "b3": params["b3"].astype(jnp.float32),
    }


@functools.partial(jax.jit,
                   static_argnames=("ln_dim", "activation", "batch_tile",
                                    "vmem_budget_bytes"))
def expert_citation_head_forward(x, prepared, *, ln_dim, activation="relu",
                                 batch_tile=None,
                                 vmem_budget_bytes=40 * 1024 * 1024):
    """Fused forward pass of ExpertCitationHead (inference semantics).

    x: (B, input_dim) float32 (unpadded; read from HBM exactly once)
    prepared: output of prepare_params() (padded/cast weights, done once)
    ln_dim: the real LayerNorm feature count (hidden dim of the first Linear)
    returns: (B, 2*num_horizons) float32 logits [alpha | beta per horizon]
    """
    B, D = x.shape
    h1_pad = prepared["w1"].shape[1]
    h2_pad = prepared["w2"].shape[1]
    O = prepared["w3"].shape[1]

    if batch_tile is None:
        batch_tile = _pick_batch_tile(B, D, h1_pad, h2_pad, O,
                                      vmem_budget_bytes)
    assert batch_tile > 0 and batch_tile % 8 == 0, (
        "batch_tile must be a positive multiple of 8 (TPU sublane)")

    # Ragged last block handled by Pallas edge masking: OOB rows are read as
    # garbage (row-local math only -> harmless) and OOB writes are dropped.
    grid = (pl.cdiv(B, batch_tile),)

    kernel = functools.partial(_head_kernel, ln_dim=ln_dim,
                               activation=activation)
    # Grid-invariant operands: constant block index, single-buffered.
    const = lambda r, c: pl.BlockSpec((r, c), lambda i: (0, 0),
                                      pipeline_mode=pl.Buffered(1))

    out = pl.pallas_call(
        kernel,
        out_shape=jax.ShapeDtypeStruct((B, O), jnp.float32),
        grid_spec=pltpu.PrefetchScalarGridSpec(
            num_scalar_prefetch=0,
            grid=grid,
            in_specs=[
                pl.BlockSpec((batch_tile, D), lambda i: (i, 0)),   # x (f32)
                const(D, h1_pad),                                  # w1
                const(1, h1_pad),                                  # b1
                const(1, h1_pad),                                  # gamma
                const(1, h1_pad),                                  # beta
                const(h1_pad, h2_pad),                             # w2
                const(1, h2_pad),                                  # b2
                const(h2_pad, O),                                  # w3
                const(1, O),                                       # b3
            ],
            out_specs=pl.BlockSpec((batch_tile, O), lambda i: (i, 0)),
        ),
        compiler_params=pltpu.CompilerParams(
            dimension_semantics=("parallel",),
            vmem_limit_bytes=48 * 1024 * 1024,  # headroom; < v7x 64 MiB physical
        ),
    )(x, prepared["w1"], prepared["b1"], prepared["gamma"], prepared["beta"],
      prepared["w2"], prepared["b2"], prepared["w3"], prepared["b3"])

    return out


def init_params(key, input_dim, hidden_dim, num_horizons, expert_id=0,
                init_mean_citation=None):
    """Mirrors the PyTorch module's layer shapes and default/bias init."""
    if expert_id in (0, 1):
        h1, h2 = hidden_dim, hidden_dim // 2
    else:
        h1, h2 = hidden_dim * 2, hidden_dim
    out_dim = 2 * num_horizons

    ks = jax.random.split(key, 6)

    def linear_init(kw, kb, fan_in, fan_out):
        bound = 1.0 / math.sqrt(fan_in)
        w = jax.random.uniform(kw, (fan_in, fan_out), jnp.float32, -bound, bound)
        b = jax.random.uniform(kb, (1, fan_out), jnp.float32, -bound, bound)
        return w, b

    w1, b1 = linear_init(ks[0], ks[1], input_dim, h1)
    w2, b2 = linear_init(ks[2], ks[3], h1, h2)
    w3, b3 = linear_init(ks[4], ks[5], h2, out_dim)

    if init_mean_citation is not None:
        log_mean = math.log1p(init_mean_citation)
        beta_val = {0: 0.2, 1: 0.0}.get(expert_id, -0.2)
        b3 = b3.at[0, :num_horizons].set(log_mean * 0.8)
        b3 = b3.at[0, num_horizons:2 * num_horizons].set(beta_val)

    return {
        "w1": w1, "b1": b1,
        "gamma": jnp.ones((1, h1), jnp.float32),
        "beta": jnp.zeros((1, h1), jnp.float32),
        "w2": w2, "b2": b2,
        "w3": w3, "b3": b3,
    }


def _reference_bf16(x, p, activation="relu"):
    """Reference matching the kernel's bf16-matmul / f32-epilogue numerics."""
    act = _ACTIVATIONS[activation]
    bf = lambda a: a.astype(jnp.bfloat16)
    h = jnp.dot(bf(x), bf(p["w1"]), preferred_element_type=jnp.float32) + p["b1"]
    h = act(h)
    mean = jnp.mean(h, axis=-1, keepdims=True)
    var = jnp.mean((h - mean) ** 2, axis=-1, keepdims=True)
    h = (h - mean) / jnp.sqrt(var + 1e-5) * p["gamma"] + p["beta"]
    h2 = act(jnp.dot(bf(h), bf(p["w2"]), preferred_element_type=jnp.float32) + p["b2"])
    return jnp.dot(bf(h2), bf(p["w3"]), preferred_element_type=jnp.float32) + p["b3"]


def _reference_f32(x, p, activation="relu"):
    """Pure-f32 reference of the PyTorch module (eval mode)."""
    act = _ACTIVATIONS[activation]
    h = act(x @ p["w1"] + p["b1"])
    mean = jnp.mean(h, axis=-1, keepdims=True)
    var = jnp.mean((h - mean) ** 2, axis=-1, keepdims=True)
    h = (h - mean) / jnp.sqrt(var + 1e-5) * p["gamma"] + p["beta"]
    h2 = act(h @ p["w2"] + p["b2"])
    return h2 @ p["w3"] + p["b3"]


if __name__ == "__main__":
    # Small shapes consistent with the module (expert_id=0 / ReLU path).
    # batch deliberately NOT a multiple of the batch tile -> exercises the
    # ragged last block handled by Pallas edge masking.
    input_dim, hidden_dim, num_horizons = 48, 32, 6
    batch = 200

    key = jax.random.PRNGKey(0)
    kx, kp = jax.random.split(key)
    x = jax.random.normal(kx, (batch, input_dim), jnp.float32)
    params = init_params(kp, input_dim, hidden_dim, num_horizons,
                         expert_id=0, init_mean_citation=5.0)
    # Weights padded / cast once, outside the hot forward path.
    prepared = prepare_params(params)
    prepared = jax.tree_util.tree_map(jax.block_until_ready, prepared)

    # Default (VMEM-budgeted, >=4-step) grid.
    out = expert_citation_head_forward(x, prepared, ln_dim=hidden_dim,
                                       activation="relu")
    out = jax.block_until_ready(out)
    assert out.shape == (batch, 2 * num_horizons)

    ref_bf16 = _reference_bf16(x, params, "relu")
    ref_f32 = _reference_f32(x, params, "relu")
    assert jnp.all(jnp.isfinite(out))
    assert jnp.allclose(out, ref_bf16, atol=1e-2, rtol=1e-2)
    assert jnp.allclose(out, ref_f32, atol=1e-1, rtol=1e-1)

    # Explicit small tile -> more grid steps + a different ragged last block.
    out2 = expert_citation_head_forward(x, prepared, ln_dim=hidden_dim,
                                        activation="relu", batch_tile=32)
    out2 = jax.block_until_ready(out2)
    assert jnp.allclose(out2, ref_bf16, atol=1e-2, rtol=1e-2)

    print("KERNEL_OK")
</pallas_src>

<mosaic_0001>
module attributes {stable_mosaic.version = 11 : i64} {
  func.func @_head_kernel(%arg0: i32, %arg1: memref<56x48xf32, #tpu.memory_space<vmem>>, %arg2: memref<48x128xbf16, #tpu.memory_space<vmem>>, %arg3: memref<1x128xf32, #tpu.memory_space<vmem>>, %arg4: memref<1x128xf32, #tpu.memory_space<vmem>>, %arg5: memref<1x128xf32, #tpu.memory_space<vmem>>, %arg6: memref<128x128xbf16, #tpu.memory_space<vmem>>, %arg7: memref<1x128xf32, #tpu.memory_space<vmem>>, %arg8: memref<128x12xbf16, #tpu.memory_space<vmem>>, %arg9: memref<1x12xf32, #tpu.memory_space<vmem>>, %arg10: memref<56x12xf32, #tpu.memory_space<vmem>>) attributes {dimension_semantics = [#tpu.dimension_semantics<parallel>], iteration_bounds = array<i64: 4>, scalar_prefetch = 0 : i64, scratch_operands = 0 : i64, tpu.core_type = #tpu.core_type<tc>, window_params = [{transform_indices = @transform_0, window_bounds = array<i64: 56, 48>}, {pipeline_mode = #tpu.pipeline_mode<synchronous>, transform_indices = @transform_1, window_bounds = array<i64: 48, 128>}, {pipeline_mode = #tpu.pipeline_mode<synchronous>, transform_indices = @transform_2, window_bounds = array<i64: 1, 128>}, {pipeline_mode = #tpu.pipeline_mode<synchronous>, transform_indices = @transform_3, window_bounds = array<i64: 1, 128>}, {pipeline_mode = #tpu.pipeline_mode<synchronous>, transform_indices = @transform_4, window_bounds = array<i64: 1, 128>}, {pipeline_mode = #tpu.pipeline_mode<synchronous>, transform_indices = @transform_5, window_bounds = array<i64: 128, 128>}, {pipeline_mode = #tpu.pipeline_mode<synchronous>, transform_indices = @transform_6, window_bounds = array<i64: 1, 128>}, {pipeline_mode = #tpu.pipeline_mode<synchronous>, transform_indices = @transform_7, window_bounds = array<i64: 128, 12>}, {pipeline_mode = #tpu.pipeline_mode<synchronous>, transform_indices = @transform_8, window_bounds = array<i64: 1, 12>}, {transform_indices = @transform_9, window_bounds = array<i64: 56, 12>}]} {
    %c0 = arith.constant 0 : index
    %c0_0 = arith.constant 0 : index
    %0 = vector.load %arg1[%c0, %c0_0] : memref<56x48xf32, #tpu.memory_space<vmem>>, vector<56x48xf32>
    %1 = arith.truncf %0 : vector<56x48xf32> to vector<56x48xbf16>
    %c0_1 = arith.constant 0 : index
    %c0_2 = arith.constant 0 : index
    %2 = vector.load %arg2[%c0_1, %c0_2] : memref<48x128xbf16, #tpu.memory_space<vmem>>, vector<48x128xbf16>
    %cst = arith.constant dense<0.000000e+00> : vector<56x128xf32>
    %3 = tpu.matmul %1, %2, %cst {dimension_numbers = #tpu.dot_dimension_numbers<[1], [0], [0], [1], [0, 0, 1, 1], [], []>} : vector<56x48xbf16>, vector<48x128xbf16>, vector<56x128xf32> -> vector<56x128xf32>
    %c0_3 = arith.constant 0 : index
    %c0_4 = arith.constant 0 : index
    %4 = vector.load %arg3[%c0_3, %c0_4] : memref<1x128xf32, #tpu.memory_space<vmem>>, vector<1x128xf32>
    %5 = vector.broadcast %4 : vector<1x128xf32> to vector<56x128xf32>
    %6 = arith.addf %3, %5 : vector<56x128xf32>
    %cst_5 = arith.constant 0.000000e+00 : f32
    %7 = vector.broadcast %cst_5 : f32 to vector<56x128xf32>
    %8 = arith.maximumf %6, %7 : vector<56x128xf32>
    %cst_6 = arith.constant dense<0.000000e+00> : vector<56xf32>
    %9 = vector.multi_reduction <add>, %8, %cst_6 [1] : vector<56x128xf32> to vector<56xf32>
    %10 = vector.shape_cast %9 : vector<56xf32> to vector<56x1xf32>
    %11 = arith.mulf %8, %8 : vector<56x128xf32>
    %cst_7 = arith.constant dense<0.000000e+00> : vector<56xf32>
    %12 = vector.multi_reduction <add>, %11, %cst_7 [1] : vector<56x128xf32> to vector<56xf32>
    %13 = vector.shape_cast %12 : vector<56xf32> to vector<56x1xf32>
    %cst_8 = arith.constant 3.125000e-02 : f32
    %14 = vector.broadcast %cst_8 : f32 to vector<56x1xf32>
    %15 = arith.mulf %10, %14 : vector<56x1xf32>
    %cst_9 = arith.constant 3.125000e-02 : f32
    %16 = vector.broadcast %cst_9 : f32 to vector<56x1xf32>
    %17 = arith.mulf %13, %16 : vector<56x1xf32>
    %18 = arith.mulf %15, %15 : vector<56x1xf32>
    %19 = arith.subf %17, %18 : vector<56x1xf32>
    %cst_10 = arith.constant 0.000000e+00 : f32
    %20 = vector.broadcast %cst_10 : f32 to vector<56x1xf32>
    %21 = arith.maximumf %19, %20 : vector<56x1xf32>
    %22 = vector.broadcast %15 : vector<56x1xf32> to vector<56x128xf32>
    %23 = arith.subf %8, %22 : vector<56x128xf32>
    %cst_11 = arith.constant 9.99999974E-6 : f32
    %24 = vector.broadcast %cst_11 : f32 to vector<56x1xf32>
    %25 = arith.addf %21, %24 : vector<56x1xf32>
    %26 = math.rsqrt %25 : vector<56x1xf32>
    %27 = vector.broadcast %26 : vector<56x1xf32> to vector<56x128xf32>
    %28 = arith.mulf %23, %27 : vector<56x128xf32>
    %c0_12 = arith.constant 0 : index
    %c0_13 = arith.constant 0 : index
    %29 = vector.load %arg4[%c0_12, %c0_13] : memref<1x128xf32, #tpu.memory_space<vmem>>, vector<1x128xf32>
    %30 = vector.broadcast %29 : vector<1x128xf32> to vector<56x128xf32>
    %31 = arith.mulf %28, %30 : vector<56x128xf32>
    %c0_14 = arith.constant 0 : index
    %c0_15 = arith.constant 0 : index
    %32 = vector.load %arg5[%c0_14, %c0_15] : memref<1x128xf32, #tpu.memory_space<vmem>>, vector<1x128xf32>
    %33 = vector.broadcast %32 : vector<1x128xf32> to vector<56x128xf32>
    %34 = arith.addf %31, %33 : vector<56x128xf32>
    %35 = arith.truncf %34 : vector<56x128xf32> to vector<56x128xbf16>
    %c0_16 = arith.constant 0 : index
    %c0_17 = arith.constant 0 : index
    %36 = vector.load %arg6[%c0_16, %c0_17] : memref<128x128xbf16, #tpu.memory_space<vmem>>, vector<128x128xbf16>
    %cst_18 = arith.constant dense<0.000000e+00> : vector<56x128xf32>
    %37 = tpu.matmul %35, %36, %cst_18 {dimension_numbers = #tpu.dot_dimension_numbers<[1], [0], [0], [1], [0, 0, 1, 1], [], []>} : vector<56x128xbf16>, vector<128x128xbf16>, vector<56x128xf32> -> vector<56x128xf32>
    %c0_19 = arith.constant 0 : index
    %c0_20 = arith.constant 0 : index
    %38 = vector.load %arg7[%c0_19, %c0_20] : memref<1x128xf32, #tpu.memory_space<vmem>>, vector<1x128xf32>
    %39 = vector.broadcast %38 : vector<1x128xf32> to vector<56x128xf32>
    %40 = arith.addf %37, %39 : vector<56x128xf32>
    %cst_21 = arith.constant 0.000000e+00 : f32
    %41 = vector.broadcast %cst_21 : f32 to vector<56x128xf32>
    %42 = arith.maximumf %40, %41 : vector<56x128xf32>
    %43 = arith.truncf %42 : vector<56x128xf32> to vector<56x128xbf16>
    %c0_22 = arith.constant 0 : index
    %c0_23 = arith.constant 0 : index
    %44 = vector.load %arg8[%c0_22, %c0_23] : memref<128x12xbf16, #tpu.memory_space<vmem>>, vector<128x12xbf16>
    %cst_24 = arith.constant dense<0.000000e+00> : vector<56x12xf32>
    %45 = tpu.matmul %43, %44, %cst_24 {dimension_numbers = #tpu.dot_dimension_numbers<[1], [0], [0], [1], [0, 0, 1, 1], [], []>} : vector<56x128xbf16>, vector<128x12xbf16>, vector<56x12xf32> -> vector<56x12xf32>
    %c0_25 = arith.constant 0 : index
    %c0_26 = arith.constant 0 : index
    %46 = vector.load %arg9[%c0_25, %c0_26] : memref<1x12xf32, #tpu.memory_space<vmem>>, vector<1x12xf32>
    %47 = vector.broadcast %46 : vector<1x12xf32> to vector<56x12xf32>
    %48 = arith.addf %45, %47 : vector<56x12xf32>
    %c0_27 = arith.constant 0 : index
    %c0_28 = arith.constant 0 : index
    %49 = vector.load %arg10[%c0_27, %c0_28] : memref<56x12xf32, #tpu.memory_space<vmem>>, vector<56x12xf32>
    tpu.vector_store %arg10[%c0_27, %c0_28], %48 {strides = array<i32>} : memref<56x12xf32, #tpu.memory_space<vmem>>, vector<56x12xf32>,
    return
  }
  func.func @transform_0(%arg0: i32) -> (i32, i32) {
    %c0_i32 = arith.constant 0 : i32
    %c0_i32_0 = arith.constant 0 : i32
    return %arg0, %c0_i32 : i32, i32
  }
  func.func @transform_1(%arg0: i32) -> (i32, i32) {
    %c0_i32 = arith.constant 0 : i32
    %c0_i32_0 = arith.constant 0 : i32
    %c0_i32_1 = arith.constant 0 : i32
    return %c0_i32, %c0_i32_0 : i32, i32
  }
  func.func @transform_2(%arg0: i32) -> (i32, i32) {
    %c0_i32 = arith.constant 0 : i32
    %c0_i32_0 = arith.constant 0 : i32
    %c0_i32_1 = arith.constant 0 : i32
    return %c0_i32, %c0_i32_0 : i32, i32
  }
  func.func @transform_3(%arg0: i32) -> (i32, i32) {
    %c0_i32 = arith.constant 0 : i32
    %c0_i32_0 = arith.constant 0 : i32
    %c0_i32_1 = arith.constant 0 : i32
    return %c0_i32, %c0_i32_0 : i32, i32
  }
  func.func @transform_4(%arg0: i32) -> (i32, i32) {
    %c0_i32 = arith.constant 0 : i32
    %c0_i32_0 = arith.constant 0 : i32
    %c0_i32_1 = arith.constant 0 : i32
    return %c0_i32, %c0_i32_0 : i32, i32
  }
  func.func @transform_5(%arg0: i32) -> (i32, i32) {
    %c0_i32 = arith.constant 0 : i32
    %c0_i32_0 = arith.constant 0 : i32
    %c0_i32_1 = arith.constant 0 : i32
    return %c0_i32, %c0_i32_0 : i32, i32
  }
  func.func @transform_6(%arg0: i32) -> (i32, i32) {
    %c0_i32 = arith.constant 0 : i32
    %c0_i32_0 = arith.constant 0 : i32
    %c0_i32_1 = arith.constant 0 : i32
    return %c0_i32, %c0_i32_0 : i32, i32
  }
  func.func @transform_7(%arg0: i32) -> (i32, i32) {
    %c0_i32 = arith.constant 0 : i32
    %c0_i32_0 = arith.constant 0 : i32
    %c0_i32_1 = arith.constant 0 : i32
    return %c0_i32, %c0_i32_0 : i32, i32
  }
  func.func @transform_8(%arg0: i32) -> (i32, i32) {
    %c0_i32 = arith.constant 0 : i32
    %c0_i32_0 = arith.constant 0 : i32
    %c0_i32_1 = arith.constant 0 : i32
    return %c0_i32, %c0_i32_0 : i32, i32
  }
  func.func @transform_9(%arg0: i32) -> (i32, i32) {
    %c0_i32 = arith.constant 0 : i32
    %c0_i32_0 = arith.constant 0 : i32
    return %arg0, %c0_i32 : i32, i32
  }
}

</mosaic_0001>

<bundles_post_ra>
// kernel: expert_citation_head_forward.1
= control target key start
LH: loop header
LB: loop body
LE: loop exit
PB: predicated region body
PF: predicated region fallthrough
CT: control target
= control target key end

     0   :  { %s1545_s30 = smov 0   ;;  %s1547_s10 = smov 0   ;;  %s1779_s0 = inlined_call_operand.vmem [shape: f32[200,48], index: 0, kind: input, shape index: {}]   ;;  %s1780_s1 = inlined_call_operand.vmem [shape: bf16[48,128], index: 1, kind: input, shape index: {}]   ;;  %s1781_s2 = inlined_call_operand.vmem [shape: f32[1,128], index: 2, kind: input, shape index: {}]   ;;  %s1782_s3 = inlined_call_operand.vmem [shape: f32[1,128], index: 3, kind: input, shape index: {}]   ;;  %s1783_s4 = inlined_call_operand.vmem [shape: f32[1,128], index: 4, kind: input, shape index: {}]   ;;  %s1784_s5 = inlined_call_operand.vmem [shape: bf16[128,128], index: 5, kind: input, shape index: {}]   ;;  %s1785_s6 = inlined_call_operand.vmem [shape: f32[1,128], index: 6, kind: input, shape index: {}]   ;;  %s1786_s7 = inlined_call_operand.vmem [shape: bf16[128,12], index: 7, kind: input, shape index: {}]   ;;  %s1787_s8 = inlined_call_operand.vmem [shape: f32[1,12], index: 8, kind: input, shape index: {}]   ;;  %s1788_s9 = inlined_call_operand.vmem [shape: f32[200,12], index: 9, kind: output, shape index: {}]  }
   0x1   :  { %s1549_s11 = smov 0  }
   0x2 LB: > { %s1558_s12 = sadd.s32 4294967295, %s1461_s11   ;;  %s1560_s13 = sadd.s32 1, %s1461_s11   ;;  %s1461_s11 = sphi %s1549_s11, %s1795_s11   ;;  %s1457_s10 = sphi %s1547_s10, %s1794_s10   ;;  %s1453_s30 = sphi %s1545_s30, %s1793_s30  }
   0x3   : > { %s217_s14 = ssub.s32 %s1461_s11, %s1560_s13  ;;  %s220_s15 = sadd.s32 1, %s1457_s10 }
   0x4   : > { %p218_p0 = scmp.eq.s32.totalorder %s217_s14, 0  ;;  %p230_p1 = scmp.ne.s32.totalorder %s1457_s10, %s1453_s30 }
   0x5   : > { %p231_p2 = scmp.eq.s32.totalorder %s1558_s12, 3  ;;  %p1144_p3 = scmp.ge.s32.totalorder %s1461_s11, 1 }
   0x6   : > { %s1568_s16 = scalar_select %p218_p0, %s1457_s10, %s220_s15  }
   0x7   : > { %p1570_p4 = por %p231_p2, %p230_p1  ;;  %p296_p5 = scmp.lt.s32.totalorder %s1461_s11, 5 }
   0x9   : > { %p297_p6 = pnand %p1144_p3, %p296_p5 }
   0xa   : > { %v1370_v0 = vld [vmem:[%s1780_s1] sm:$0xff] (!%p297_p6)   ;;  %s1578_s20 = smul.u32 (!%p297_p6), 7, %s1558_s12  ;;  %v1371_v1 = vld [vmem:[%s1780_s1 + $0x8] sm:$0xff] (!%p297_p6)   ;;  %v1372_v2 = vld [vmem:[%s1780_s1 + $0x10] sm:$0xff] (!%p297_p6)   ;;  %vm397_vm0 = vcmask (!%p297_p6), 392192   ;;  %s332_s28 = sand.u32 (!%p297_p6), 1, %s1453_s30  }
   0xb   : > { %300 = sbr.rel (%p297_p6) target bundleno = 938 (0x3aa), region = 56  ;;  %1218 = vmatprep.subr.bf16.mxu0 (!%p297_p6), %v1370_v0  ;;  %v1146_v14 = vld [vmem:[%s1781_s2] ss:$0 sm:$0xff] (!%p297_p6)  ;;  %v1374_v45 = vld [vmem:[%s1784_s5 + $0x8] sm:$0xff] (!%p297_p6)   ;;  %v1375_v46 = vld [vmem:[%s1784_s5 + $0x10] sm:$0xff] (!%p297_p6)   ;;  %vm892_vm1 = vcmask (!%p297_p6), 97280  }
   0xc   : > { %p340_p7 = scmp.lt.s32.totalorder (!%p297_p6), %s1578_s20, 24  ;;  %1219 = vmatpush3.bf16.msra.mxu0 (!%p297_p6), %v1370_v0  ;;  %v1373_v42 = vld [vmem:[%s1784_s5] sm:$0xff] (!%p297_p6)   ;;  %v1376_v47 = vld [vmem:[%s1784_s5 + $0x18] sm:$0xff] (!%p297_p6)   ;;  %v1378_v49 = vld [vmem:[%s1784_s5 + $0x28] sm:$0xff] (!%p297_p6)  }
   0xd   : > { %1220 = vmatprep.subr.bf16.mxu0 (!%p297_p6), %v1371_v1  ;;  %1232 = vmatprep.subr.bf16.mxu1 (!%p297_p6), %v1373_v42  ;;  %v1377_v48 = vld [vmem:[%s1784_s5 + $0x20] sm:$0xff] (!%p297_p6)   ;;  %v1379_v50 = vld [vmem:[%s1784_s5 + $0x30] sm:$0xff] (!%p297_p6)   ;;  %v1380_v51 = vld [vmem:[%s1784_s5 + $0x38] sm:$0xff] (!%p297_p6)  }
   0xe   : > { %1233 = vmatpush3.bf16.msra.mxu1 (!%p297_p6), %v1373_v42  ;;  %v1381_v52 = vld [vmem:[%s1786_s7] sm:$0xff] (!%p297_p6)   ;;  %v1382_v53 = vld [vmem:[%s1786_s7 + $0x8] sm:$0xff] (!%p297_p6)   ;;  %v1383_v54 = vld [vmem:[%s1786_s7 + $0x10] sm:$0xff] (!%p297_p6)  }
   0xf   : > { %1234 = vmatprep.subr.bf16.mxu1 (!%p297_p6), %v1374_v45  ;;  %v1384_v55 = vld [vmem:[%s1786_s7 + $0x18] sm:$0xff] (!%p297_p6)   ;;  %v1385_v56 = vld [vmem:[%s1786_s7 + $0x20] sm:$0xff] (!%p297_p6)   ;;  %v1386_v57 = vld [vmem:[%s1786_s7 + $0x28] sm:$0xff] (!%p297_p6)  }
  0x10   : > { %1221 = vmatpush3.bf16.msra.mxu0 (!%p297_p6), %v1371_v1 }
  0x11   : > { %1222 = vmatprep.subr.bf16.mxu0 (!%p297_p6), %v1372_v2 }
  0x12   : > { %s341_s25 = scalar_select %p340_p7, %s1578_s20, 24  ;;  %1235 = vmatpush3.bf16.msra.mxu1 %v1374_v45 }
  0x13   : > { %1236 = vmatprep.subr.bf16.mxu1 %v1375_v46  ;;  %s908_s30 = ssub.s32 (%p1570_p4), 25, %s1578_s20  ;;  %s1186_s18 = smul.u32 (%p1570_p4), 56, %s1558_s12 }
  0x14   : > { %s1145_s26 = sshll.u32 %s341_s25, 3  ;;  %1223 = vmatpush3.bf16.msra.mxu0 %v1372_v2  ;;  %p909_p8 = scmp.lt.s32.totalorder (%p1570_p4), %s908_s30, 7 }
  0x15   : > { %s343_s29 = scalar_lea.vmem %s1779_s0, %s1145_s26  ;;  %1256 = vmatprep.subr.bf16.mxu0 %v1381_v52  ;;  %s1730_s22 = scalar_lea.vmem (%p1570_p4), %s1788_s9, %s1186_s18  }
  0x16   : > { %v355_v3 = vld [vmem:[%s343_s29] sm:$0xff]  ;;  %v356_v4 = vld [vmem:[%s343_s29 + $0x8] sm:$0xff]  ;;  %v357_v5 = vld [vmem:[%s343_s29 + $0x10] sm:$0xff]  ;;  %1237 = vmatpush3.bf16.msra.mxu1 %v1375_v46 }
  0x17   : > { %v362_v6 = vpack.c.bf16 %v356_v4, %v355_v3  ;;  %v358_v7 = vld [vmem:[%s343_s29 + $0x18] sm:$0xff]  ;;  %v359_v8 = vld [vmem:[%s343_s29 + $0x20] sm:$0xff]  ;;  %v360_v9 = vld [vmem:[%s343_s29 + $0x28] sm:$0xff]  ;;  %1238 = vmatprep.subr.bf16.mxu1 %v1376_v47 }
  0x18   : > { %v363_v10 = vpack.c.bf16 %v358_v7, %v357_v5  ;;  %v364_v11 = vpack.c.bf16 %v360_v9, %v359_v8  ;;  %v361_v12 = vld [vmem:[%s343_s29 + $0x30] sm:$0xff]  ;;  %s1280_s29 = smul.u32 56, %s332_s28 }
  0x19   : > { %1224 = vmatprep.mubr.msk.bf16.mxu0 %vm397_vm0, %v362_v6  ;;  %v365_v13 = vpack.c.bf16 %v361_v12, %v361_v12 }
  0x1a   : > { %1225 = vmatmul.mubr.msk.bf16.vlgmr.msra.gmra.mrb[0].mxu0 %vm397_vm0, %v363_v10  ;;  %1239 = vmatpush3.bf16.msra.mxu1 %v1376_v47  ;;  %s1707_s15 = scalar_lea.vmem [#allocation2], %s1280_s29  }
  0x1b   : > { %1228 = vmatprep.mubr.msk.bf16.mxu0 %vm397_vm0, %v364_v11  ;;  %1240 = vmatprep.subr.bf16.mxu1 %v1377_v48 }
  0x1c   : > { %1257 = vmatpush3.bf16.msra.mxu0 %v1381_v52 }
  0x1d   : > { %1258 = vmatprep.subr.bf16.mxu0 %v1382_v53 }
  0x1e   : > { %1241 = vmatpush3.bf16.msra.mxu1 %v1377_v48 }
  0x1f   : > { %1242 = vmatprep.subr.bf16.mxu1 %v1378_v49 }
  0x20   : > { %1259 = vmatpush3.bf16.msra.mxu0 %v1382_v53 }
  0x21   : > { %1260 = vmatprep.subr.bf16.mxu0 %v1383_v54 }
  0x22   : > { %1229 = vmatmul.mubr.msk.bf16.gmra.mrb[4].mxu0 %vm397_vm0, %v365_v13  ;;  %1243 = vmatpush3.bf16.msra.mxu1 %v1378_v49 }
  0x23   : > { %1244 = vmatprep.subr.bf16.mxu1 %v1379_v50 }
  0x24   : > { %1261 = vmatpush3.bf16.msra.mxu0 %v1383_v54 }
  0x25   : > { %1262 = vmatprep.subr.bf16.mxu0 %v1384_v55 }
  0x26   : > { %1245 = vmatpush3.bf16.msra.mxu1 %v1379_v50 }
  0x27   : > { %1246 = vmatprep.subr.bf16.mxu1 %v1380_v51 }
  0x28   : > { %1263 = vmatpush3.bf16.msra.mxu0 %v1384_v55 }
  0x29   : > { %1264 = vmatprep.subr.bf16.mxu0 %v1385_v56 }
  0x2a   : > { %1247 = vmatpush3.bf16.msra.mxu1 %v1380_v51 }
  0x2c   : > { %1265 = vmatpush3.bf16.msra.mxu0 %v1385_v56 }
  0x2d   : > { %1266 = vmatprep.subr.bf16.mxu0 %v1386_v57 }
  0x30   : > { %1267 = vmatpush3.bf16.msra.mxu0 %v1386_v57 }
  0xed   : > { %v1226_v15 = vpop.f32.mrb[0].mxu0 }
  0xee   : > { %v453_v16 = vadd.f32 %v1226_v15, %v1146_v14  ;;  %v444_v17 = vpop.f32.mrb[1].mxu0 }
  0xef   : > { %v445_v18 = vadd.f32 %v1146_v14, %v444_v17  ;;  %v1227_v19 = vpop.f32.mrb[2].mxu0 }
  0xf0   : > { %v1594_v20 = vmax.f32 %v453_v16, 0.0  ;;  %v456_v21 = vadd.f32 %v1227_v19, %v1146_v14  ;;  %v447_v22 = vpop.f32.mrb[3].mxu0 }
  0xf1   : > { %v1596_v23 = vmax.f32 %v445_v18, 0.0  ;;  %v448_v25 = vadd.f32 %v1146_v14, %v447_v22 }
  0xf2   : > { %485 = vadd.xlane.f32.xlu1 %v1594_v20  ;;  %v1600_v24 = vmax.f32 %v456_v21, 0.0  ;;  %v497_v26 = vmul.f32 %v1594_v20, %v1594_v20 }
  0xf3   : > { %481 = vadd.xlane.f32.xlu0 %v1596_v23  ;;  %v1605_v30 = vmax.f32 %v448_v25, 0.0  ;;  %v495_v37 = vmul.f32 %v1596_v23, %v1596_v23 }
  0xf4   : > { %v498_v31 = vmul.f32 %v1600_v24, %v1600_v24 }
  0xf5   : > { %v1230_v27 = vpop.f32.mrb[4].mxu0  ;;  %v496_v35 = vmul.f32 %v1605_v30, %v1605_v30 }
  0xf6   : > { %487 = vadd.xlane.f32.xlu1 %v1600_v24  ;;  %v460_v28 = vpop.f32.mrb[5].mxu0  ;;  %v469_v36 = vadd.f32 %v1230_v27, %v1146_v14 }
  0xf7   : > { %506 = vadd.xlane.f32.xlu0 %v497_v26  ;;  %v1231_v29 = vpop.f32.mrb[6].mxu0  ;;  %v461_v34 = vadd.f32 %v1146_v14, %v460_v28 }
  0xf8   : > { %v463_v32 = vpop.f32.mrb[7].mxu0  ;;  %v1618_v40 = vmax.f32 %v469_v36, 0.0 }
  0xf9   : > { %v464_v33 = vadd.f32 %v1146_v14, %v463_v32  ;;  %v1616_v39 = vmax.f32 %v461_v34, 0.0 }
  0xfa   : > { %508 = vadd.xlane.f32.xlu1 %v498_v31  ;;  %v501_v43 = vmul.f32 %v1618_v40, %v1618_v40 }
  0xfb   : > { %483 = vadd.xlane.f32.xlu0 %v1605_v30  ;;  %v1614_v38 = vmax.f32 %v464_v33, 0.0  ;;  %v499_v41 = vmul.f32 %v1616_v39, %v1616_v39 }
  0xfd   : > { %v500_v44 = vmul.f32 %v1614_v38, %v1614_v38 }
  0xfe   : > { %504 = vadd.xlane.f32.xlu1 %v496_v35 }
  0xff   : > { %502 = vadd.xlane.f32.xlu0 %v495_v37 }
 0x102   : > { %491 = vadd.xlane.f32.xlu1 %v1614_v38 }
 0x103   : > { %493 = vadd.xlane.f32.xlu0 %v1618_v40 }
 0x106   : > { %510 = vadd.xlane.f32.xlu1 %v499_v41 }
 0x107   : > { %489 = vadd.xlane.f32.xlu0 %v1616_v39 }
 0x10a   : > { %514 = vadd.xlane.f32.xlu1 %v501_v43 }
 0x10b   : > { %512 = vadd.xlane.f32.xlu0 %v500_v44 }
 0x17f   : > { %v486_v58 = vpop.xlane.xlu1 %485 }
 0x180   : > { %v482_v59 = vpop.xlane.xlu0 %481  ;;  %v1671_v60 = vmul.f32 0.03125, %v486_v58 }
 0x181   : > { %v1675_v7 = vmul.f32 0.03125, %v482_v59 }
 0x182   : > { %v532_v0 = vmul.f32 %v1671_v60, %v1671_v60  ;;  %v553_v53 = vsub.f32 %v1594_v20, %v1671_v60 }
 0x183   : > { %v488_v61 = vpop.xlane.xlu1 %487  ;;  %v530_v17 = vmul.f32 %v1675_v7, %v1675_v7 }
 0x184   : > { %v519_v62 = vmul.f32 0.03125, %v488_v61  ;;  %v507_v63 = vpop.xlane.xlu0 %506 }
 0x185   : > { %v525_v1 = vmul.f32 0.03125, %v507_v63 }
 0x186   : > { %v533_v4 = vmul.f32 %v519_v62, %v519_v62  ;;  %v554_v47 = vsub.f32 %v1600_v24, %v519_v62  ;;  %v551_v24 = vsub.f32 %v1596_v23, %v1675_v7  ;;  %v1154_v62 = vld [vmem:[%s1782_s3] ss:$0 sm:$0xff] }
 0x187   : > { %v539_v2 = vsub.f32 %v525_v1, %v532_v0  ;;  %v509_v3 = vpop.xlane.xlu1 %508  ;;  %v1155_v23 = vld [vmem:[%s1783_s4] ss:$0 sm:$0xff] }
 0x188   : > { %v526_v5 = vmul.f32 0.03125, %v509_v3  ;;  %v484_v6 = vpop.xlane.xlu0 %483 }
 0x189   : > { %v546_v8 = vmax.f32 %v539_v2, 0.0  ;;  %v517_v9 = vmul.f32 0.03125, %v484_v6 }
 0x18a   : > { %v540_v10 = vsub.f32 %v526_v5, %v533_v4 }
 0x18b   : > { %v560_v11 = vadd.f32 1e-05, %v546_v8  ;;  %v531_v12 = vmul.f32 %v517_v9, %v517_v9  ;;  %v505_v13 = vpop.xlane.xlu1 %504  ;;  %v552_v58 = vsub.f32 %v1605_v30, %v517_v9 }
 0x18c   : > { %v547_v14 = vmax.f32 %v540_v10, 0.0  ;;  %v524_v15 = vmul.f32 0.03125, %v505_v13  ;;  %v503_v16 = vpop.xlane.xlu0 %502 }
 0x18d   : > { %v523_v18 = vmul.f32 0.03125, %v503_v16  ;;  %1389 = vrsqrt.f32 %v560_v11 }
 0x18e   : > { %v561_v19 = vadd.f32 1e-05, %v547_v14  ;;  %v538_v21 = vsub.f32 %v524_v15, %v531_v12 }
 0x18f   : > { %v537_v22 = vsub.f32 %v523_v18, %v530_v17  ;;  %v492_v25 = vpop.xlane.xlu1 %491 }
 0x190   : > { %1391 = vrsqrt.f32 %v561_v19  ;;  %v545_v26 = vmax.f32 %v538_v21, 0.0  ;;  %v494_v27 = vpop.xlane.xlu0 %493  ;;  %v521_v35 = vmul.f32 0.03125, %v492_v25 }
 0x191   : > { %v544_v28 = vmax.f32 %v537_v22, 0.0  ;;  %v522_v33 = vmul.f32 0.03125, %v494_v27 }
 0x192   : > { %v559_v29 = vadd.f32 1e-05, %v545_v26  ;;  %v535_v48 = vmul.f32 %v521_v35, %v521_v35  ;;  %v556_v17 = vsub.f32 %v1614_v38, %v521_v35  ;;  %v1388_v38 = vld [vmem:[%s1786_s7 + $0x38] sm:$0xff]  }
 0x193   : > { %v558_v31 = vadd.f32 1e-05, %v544_v28  ;;  %v511_v32 = vpop.xlane.xlu1 %510  ;;  %v536_v43 = vmul.f32 %v522_v33, %v522_v33  ;;  %v557_v15 = vsub.f32 %v1618_v40, %v522_v33  ;;  %v1387_v40 = vld [vmem:[%s1786_s7 + $0x30] sm:$0xff]   ;;  %v1156_v33 = vld [vmem:[%s1785_s6] ss:$0 sm:$0xff] }
 0x194   : > { %1393 = vrsqrt.f32 %v559_v29  ;;  %v490_v34 = vpop.xlane.xlu0 %489  ;;  %v527_v37 = vmul.f32 0.03125, %v511_v32  ;;  %1268 = vmatprep.subr.bf16.mxu0 %v1387_v40 }
 0x195   : > { %1395 = vrsqrt.f32 %v558_v31  ;;  %v520_v36 = vmul.f32 0.03125, %v490_v34  ;;  %1269 = vmatpush3.bf16.msra.mxu0 %v1387_v40 }
 0x196   : > { %1270 = vmatprep.subr.bf16.mxu0 %v1388_v38 }
 0x197   : > { %v534_v41 = vmul.f32 %v520_v36, %v520_v36  ;;  %v515_v42 = vpop.xlane.xlu1 %514  ;;  %v1390_v46 = vpop.eup %1389  ;;  %v555_v13 = vsub.f32 %v1616_v39, %v520_v36 }
 0x198   : > { %v529_v44 = vmul.f32 0.03125, %v515_v42  ;;  %v513_v45 = vpop.xlane.xlu0 %512  ;;  %v574_v63 = vmul.f32 %v1390_v46, %v553_v53 }
 0x199   : > { %v541_v49 = vsub.f32 %v527_v37, %v534_v41  ;;  %v528_v50 = vmul.f32 0.03125, %v513_v45  ;;  %1271 = vmatpush3.bf16.msra.mxu0 %v1388_v38 }
 0x19a   : > { %v1392_v51 = vpop.eup %1391  ;;  %v543_v52 = vsub.f32 %v529_v44, %v536_v43  ;;  %v588_v5 = vmul.f32 %v1154_v62, %v574_v63 }
 0x19b   : > { %v548_v54 = vmax.f32 %v541_v49, 0.0  ;;  %v542_v55 = vsub.f32 %v528_v50, %v535_v48  ;;  %v575_v56 = vmul.f32 %v1392_v51, %v554_v47 }
 0x19c   : > { %v550_v57 = vmax.f32 %v543_v52, 0.0  ;;  %v602_v10 = vadd.f32 %v1155_v23, %v588_v5 }
 0x19d   : > { %v562_v59 = vadd.f32 1e-05, %v548_v54  ;;  %v549_v61 = vmax.f32 %v542_v55, 0.0  ;;  %v589_v3 = vmul.f32 %v1154_v62, %v575_v56 }
 0x19e   : > { %v1394_v0 = vpop.eup %1393  ;;  %v564_v1 = vadd.f32 1e-05, %v550_v57 }
 0x19f   : > { %v1396_v2 = vpop.eup %1395  ;;  %1397 = vrsqrt.f32 %v562_v59  ;;  %v563_v20 = vadd.f32 1e-05, %v549_v61  ;;  %v573_v60 = vmul.f32 %v1394_v0, %v552_v58  ;;  %v603_v8 = vadd.f32 %v1155_v23, %v589_v3 }
 0x1a0   : > { %1399 = vrsqrt.f32 %v564_v1  ;;  %v572_v4 = vmul.f32 %v1396_v2, %v551_v24  ;;  %v1165_v24 = vld [vmem:[%s1787_s8] ss:$0 sm:$0xff] }
 0x1a1   : > { %1401 = vrsqrt.f32 %v563_v20  ;;  %v587_v30 = vmul.f32 %v1154_v62, %v573_v60  ;;  %v608_v12 = vpack.c.bf16 %v603_v8, %v602_v10 }
 0x1a2   : > { %v586_v6 = vmul.f32 %v1154_v62, %v572_v4 }
 0x1a3   : > { %v601_v7 = vadd.f32 %v1155_v23, %v587_v30 }
 0x1a4   : > { %v600_v9 = vadd.f32 %v1155_v23, %v586_v6 }
 0x1a6   : > { %v607_v11 = vpack.c.bf16 %v601_v7, %v600_v9 }
 0x1a8   : > { %1248 = vmatprep.mubr.bf16.mxu1 %v607_v11 }
 0x1a9   : > { %v1398_v14 = vpop.eup %1397  ;;  %1249 = vmatmul.mubr.bf16.vlgmr.msra.gmra.mrb[0].mxu1 %v608_v12 }
 0x1aa   : > { %v1400_v16 = vpop.eup %1399  ;;  %v576_v18 = vmul.f32 %v1398_v14, %v555_v13 }
 0x1ab   : > { %v1402_v19 = vpop.eup %1401  ;;  %v578_v21 = vmul.f32 %v1400_v16, %v557_v15 }
 0x1ac   : > { %v590_v22 = vmul.f32 %v1154_v62, %v576_v18  ;;  %v577_v25 = vmul.f32 %v1402_v19, %v556_v17 }
 0x1ad   : > { %v592_v26 = vmul.f32 %v1154_v62, %v578_v21 }
 0x1ae   : > { %v591_v27 = vmul.f32 %v1154_v62, %v577_v25  ;;  %v604_v29 = vadd.f32 %v1155_v23, %v590_v22 }
 0x1af   : > { %v606_v28 = vadd.f32 %v1155_v23, %v592_v26 }
 0x1b0   : > { %v605_v31 = vadd.f32 %v1155_v23, %v591_v27 }
 0x1b1   : > { %v610_v39 = vpack.c.bf16 %v606_v28, %v606_v28 }
 0x1b2   : > { %v609_v32 = vpack.c.bf16 %v605_v31, %v604_v29 }
 0x1b4   : > { %1252 = vmatprep.mubr.bf16.mxu1 %v609_v32 }
 0x1b5   : > { %1253 = vmatmul.mubr.bf16.gmra.mrb[4].mxu1 %v610_v39 }
 0x27c   : > { %v1250_v34 = vpop.f32.mrb[0].mxu1 }
 0x27d   : > { %v725_v35 = vadd.f32 %v1250_v34, %v1156_v33  ;;  %v716_v36 = vpop.f32.mrb[1].mxu1 }
 0x27e   : > { %v717_v37 = vadd.f32 %v1156_v33, %v716_v36  ;;  %v1251_v41 = vpop.f32.mrb[2].mxu1 }
 0x27f   : > { %v728_v42 = vadd.f32 %v1251_v41, %v1156_v33  ;;  %v719_v43 = vpop.f32.mrb[3].mxu1  ;;  %v748_v45 = vmax.f32 %v725_v35, 0.0 }
 0x280   : > { %v720_v44 = vadd.f32 %v1156_v33, %v719_v43  ;;  %v746_v47 = vmax.f32 %v717_v37, 0.0 }
 0x281   : > { %v749_v46 = vmax.f32 %v728_v42, 0.0 }
 0x282   : > { %v747_v48 = vmax.f32 %v720_v44, 0.0 }
 0x283   : > { %v754_v49 = vpack.c.bf16 %v749_v46, %v748_v45 }
 0x284   : > { %v753_v50 = vpack.c.bf16 %v747_v48, %v746_v47 }
 0x286   : > { %1272 = vmatprep.mubr.bf16.mxu0 %v753_v50 }
 0x287   : > { %1273 = vmatmul.mubr.bf16.vlgmr.msra.gmra.mrb[8].mxu0 %v754_v49 }
 0x288   : > { %v1254_v51 = vpop.f32.mrb[4].mxu1 }
 0x289   : > { %v741_v52 = vadd.f32 %v1254_v51, %v1156_v33  ;;  %v732_v53 = vpop.f32.mrb[5].mxu1 }
 0x28a   : > { %v733_v54 = vadd.f32 %v1156_v33, %v732_v53  ;;  %v1255_v55 = vpop.f32.mrb[6].mxu1 }
 0x28b   : > { %v735_v56 = vpop.f32.mrb[7].mxu1  ;;  %v752_v58 = vmax.f32 %v741_v52, 0.0 }
 0x28c   : > { %v736_v57 = vadd.f32 %v1156_v33, %v735_v56  ;;  %v750_v59 = vmax.f32 %v733_v54, 0.0 }
 0x28d   : > { %v756_v0 = vpack.c.bf16 %v752_v58, %v752_v58 }
 0x28e   : > { %v751_v61 = vmax.f32 %v736_v57, 0.0 }
 0x290   : > { %v755_v63 = vpack.c.bf16 %v751_v61, %v750_v59 }
 0x292   : > { %1276 = vmatprep.mubr.bf16.mxu0 %v755_v63 }
 0x293   : > { %1277 = vmatmul.mubr.bf16.gmra.mrb[12].mxu0 %v756_v0 }
 0x35a   : > { %v1274_v62 = vpop.f32.mrb[8].mxu0 }
 0x35b   : > { %v871_v1 = vadd.f32 %v1274_v62, %v1165_v24  ;;  %v862_v2 = vpop.f32.mrb[9].mxu0 }
 0x35c   : > { %v863_v20 = vadd.f32 %v1165_v24, %v862_v2  ;;  %v1275_v60 = vpop.f32.mrb[10].mxu0 }
 0x35d   : > { %895 = vst.msk [vmem:[%s1707_s15 + $0x10] sm:$0xff] %vm892_vm1, %v871_v1  ;;  %v874_v3 = vadd.f32 %v1275_v60, %v1165_v24  ;;  %v865_v4 = vpop.f32.mrb[11].mxu0 }
 0x35e   : > { %893 = vst.msk [vmem:[%s1707_s15] sm:$0xff] %vm892_vm1, %v863_v20  ;;  %v866_v30 = vadd.f32 %v1165_v24, %v865_v4 }
 0x35f   : > { %896 = vst.msk [vmem:[%s1707_s15 + $0x18] sm:$0xff] %vm892_vm1, %v874_v3 }
 0x360   : > { %894 = vst.msk [vmem:[%s1707_s15 + $0x8] sm:$0xff] %vm892_vm1, %v866_v30 }
 0x366   : > { %v1278_v5 = vpop.f32.mrb[12].mxu0  ;;  %906 = sbr.rel (!%p1570_p4) target bundleno = 938 (0x3aa), region = 60 }
 0x367   : > { %v887_v6 = vadd.f32 %v1278_v5, %v1165_v24  ;;  %v878_v23 = vpop.f32.mrb[13].mxu0 }
 0x368   : > { %v879_v7 = vadd.f32 %v1165_v24, %v878_v23  ;;  %v1279_v8 = vpop.f32.mrb[14].mxu0 }
 0x369   : > { %899 = vst.msk [vmem:[%s1707_s15 + $0x30] sm:$0xff] %vm892_vm1, %v887_v6  ;;  %v881_v9 = vpop.f32.mrb[15].mxu0 }
 0x36a   : > { %897 = vst.msk [vmem:[%s1707_s15 + $0x20] sm:$0xff] %vm892_vm1, %v879_v7  ;;  %v882_v10 = vadd.f32 %v1165_v24, %v881_v9 }
 0x36c   : > { %898 = vst.msk [vmem:[%s1707_s15 + $0x28] sm:$0xff] %vm892_vm1, %v882_v10 }
 0x36d   : > { %s1797_s30 = smov (!%p909_p8, %s908_s30), 7 }
 0x36e   : > { %s1174_s23 = sshll.u32 %s1797_s30, 7 }
 0x36f   : > { %p1177_p9 = scmp.eq.s32.totalorder %s1174_s23, 0 }
 0x370   : > { %1403 = sdivrem.u32 (!%p1177_p9), %s1797_s30, 7 }
 0x371   : > { %917 = sbr.rel (%p1177_p9) target bundleno = 938 (0x3aa), region = 64 }
 0x379   : > { %s1736_s17 = spop.drf %1403 }
 0x37a   : > { %p1178_p10 = scmp.le.s32.totalorder %s1736_s17, 0 }
 0x37b   : > { %s1790_s12 = smov (!%p1178_p10), %s1730_s22  ;;  %s1791_s20 = smov (!%p1178_p10), %s1707_s15 }
 0x37c   : > { %1097 = sbr.rel (%p1178_p10) target bundleno = 909 (0x38d), region = 140  ;;  %s1745_s24 = smov (!%p1178_p10), 0  }
 0x37d   : > { %s1747_s25 = smov (!%p1178_p10), 0  }
 0x383 LB: >> { %v993_v11 = vld [vmem:[%s1469_s20] sm:$0xff]  ;;  %v995_v12 = vld [vmem:[%s1469_s20 + $0x8] sm:$0xff]  ;;  %v997_v13 = vld [vmem:[%s1469_s20 + $0x10] sm:$0xff]  ;;  %s1007_s26 = sadd.s32 1, %s1473_s24  ;;  %s987_s25 = sadd.s32 1, %s1477_s25   ;;  %s1477_s25 = sphi %s1747_s25, %s987_s25   ;;  %s1473_s24 = sphi %s1745_s24, %s1792_s24   ;;  %s1469_s20 = sphi %s1791_s20, %s1012_s20   ;;  %s1465_s12 = sphi %s1790_s12, %s1013_s12  }
 0x384   : >> { %994 = vst [vmem:[%s1465_s12] sm:$0xff] %v993_v11  ;;  %996 = vst [vmem:[%s1465_s12 + $0x8] sm:$0xff] %v995_v12  ;;  %v999_v14 = vld [vmem:[%s1469_s20 + $0x18] sm:$0xff]  ;;  %v1001_v15 = vld [vmem:[%s1469_s20 + $0x20] sm:$0xff]  ;;  %p1008_p11 = scmp.ge.s32.totalorder %s1007_s26, %s1736_s17  ;;  %p986_p12 = scmp.ge.s32.totalorder %s987_s25, %s1736_s17 }
 0x385   : >> { %998 = vst [vmem:[%s1465_s12 + $0x10] sm:$0xff] %v997_v13  ;;  %v1003_v16 = vld [vmem:[%s1469_s20 + $0x28] sm:$0xff]  ;;  %1000 = vst [vmem:[%s1465_s12 + $0x18] sm:$0xff] %v999_v14  ;;  %v1005_v17 = vld [vmem:[%s1469_s20 + $0x30] sm:$0xff] }
 0x386   : >> { %1002 = vst [vmem:[%s1465_s12 + $0x20] sm:$0xff] %v1001_v15  ;;  %1004 = vst [vmem:[%s1465_s12 + $0x28] sm:$0xff] %v1003_v16  ;;  %s1799_s26 = smov (%p1008_p11, %s1007_s26), 0  ;;  %989 = sbr.rel (!%p986_p12) target bundleno = 899 (0x383), region = 146 }
 0x387   : >> { %1006 = vst [vmem:[%s1465_s12 + $0x30] sm:$0xff] %v1005_v17  ;;  %s1010_s27 = smul.u32 56, %s1799_s26  ;;  %s1792_s24 = smov %s1799_s26 }
 0x389   : >> { %s1012_s20 = scalar_lea.vmem %s1707_s15, %s1010_s27 [#allocation2]   ;;  %s1013_s12 = scalar_lea.vmem %s1730_s22, %s1010_s27  }
 0x38d PF: > { %1405 = sdivrem.u32 %s1797_s30, 7 }
 0x38e   : > { %s1179_s28 = smul.u32 56, %s1736_s17 }
 0x390   : > { %s1018_s29 = scalar_lea.vmem %s1707_s15, %s1179_s28 [#allocation2]   ;;  %s1020_s11 = scalar_lea.vmem %s1730_s22, %s1179_s28  }
 0x396   : > { %s1406_s14 = spop.drf %1405 }
 0x397   : > { %p1181_p13 = scmp.le.s32.totalorder %s1406_s14, 0 }
 0x398   : > { %s1479_s18 = smov (!%p1181_p13), %s1020_s11   ;;  %s1483_s19 = smov (!%p1181_p13), %s1018_s29  }
 0x399   : > { %1111 = sbr.rel (%p1181_p13) target bundleno = 938 (0x3aa), region = 151  ;;  %s1487_s21 = smov (!%p1181_p13), 0  }
 0x39a   : > { %s1491_s23 = smov (!%p1181_p13), 0  }
 0x3a0 LB: >> { %v1030_v18 = vld [vmem:[%s1485_s19] sm:$0xff]  ;;  %s1032_s12 = sadd.s32 1, %s1489_s21  ;;  %s1024_s23 = sadd.s32 1, %s1493_s23   ;;  %s1493_s23 = sphi %s1491_s23, %s1024_s23   ;;  %s1489_s21 = sphi %s1487_s21, %s1488_s21   ;;  %s1485_s19 = sphi %s1483_s19, %s1037_s19   ;;  %s1481_s18 = sphi %s1479_s18, %s1038_s18  }
 0x3a1   : >> { %1031 = vst [vmem:[%s1481_s18] sm:$0xff] %v1030_v18  ;;  %p1033_p0 = scmp.ge.s32.totalorder %s1032_s12, %s1406_s14  ;;  %p1023_p1 = scmp.ge.s32.totalorder %s1024_s23, %s1406_s14 }
 0x3a3   : >> { %s1801_s12 = smov (%p1033_p0, %s1032_s12), 0  ;;  %1026 = sbr.rel (!%p1023_p1) target bundleno = 928 (0x3a0), region = 157 }
 0x3a4   : >> { %s1182_s15 = sshll.u32 %s1801_s12, 3  ;;  %s1488_s21 = smov %s1801_s12  }
 0x3a5   : >> { %s1037_s19 = scalar_lea.vmem %s1018_s29, %s1182_s15 [#allocation2]   ;;  %s1038_s18 = scalar_lea.vmem %s1020_s11, %s1182_s15  }
 0x3aa PF: > { %p16_p2 = scmp.ge.s32.totalorder %s1560_s13, 6   ;;  %s1793_s30 = smov %s1457_s10 }
 0x3ab   : > { %s1794_s10 = smov %s1568_s16  ;;  %s1795_s11 = smov %s1560_s13 }
 0x3ac   :  { %18 = sbr.rel (!%p16_p2) target bundleno = 2 (0x2), region = 168 }

</bundles_post_ra>
